<compile_context>
chip_gen: v5e
topology: v5e:2x2
jax: 0.10.0
libtpu: 0.0.40
codegen_flags: <defaults>
</compile_context>

<pallas_src>
import jax
import jax.numpy as jnp
from jax.experimental import pallas as pl
from jax.experimental.pallas import tpu as pltpu

_PAD_NEG = -1e9              # bias for padded vocab columns -> exp() == 0 in both paths
_VMEM_BUDGET = 24 << 20      # generation-safe working-set target (v7x: 64 MiB physical)
_CACHE_BUDGET = 16 << 20     # max VMEM spent on the per-call eta cache
_SINGLE_SHOT_BYTES = 8 << 20


# ----------------------------------------------------------------------------
# Kernels
# ----------------------------------------------------------------------------
def _single_shot_kernel(af_ref, z_ref, wt_ref, b_ref, bnb_ref, out_ref):
    eta = jnp.dot(z_ref[...], wt_ref[...],
                  preferred_element_type=jnp.float32) + b_ref[...]
    mean = jnp.mean(eta, axis=0, keepdims=True)
    var = jnp.mean((eta - mean) ** 2, axis=0, keepdims=True)
    eta_bn = (eta - mean) * jax.lax.rsqrt(var + 0.001) + bnb_ref[...]

    def _softmax(x):
        m = jnp.max(x, axis=-1, keepdims=True)
        e = jnp.exp(x - m)
        return e * pl.reciprocal(jnp.sum(e, axis=-1, keepdims=True), approx=False)

    af = af_ref[0]
    out_ref[...] = (af * _softmax(eta)
                    + (1.0 - af) * _softmax(eta_bn)).astype(out_ref.dtype)


def _make_tiled_kernel(cache_eta: bool):
    """Two-phase online-softmax kernel; `cache_eta` is a static Python flag."""

    def kernel(af_ref, z_ref, wt_ref, b_ref, bnb_ref, out_ref, *scratch):
        if cache_eta:
            eta_c, m_e, l_e, m_b, l_b = scratch
        else:
            m_e, l_e, m_b, l_b = scratch
        phase = pl.program_id(0)
        v = pl.program_id(1)

        @pl.when((phase == 0) & (v == 0))
        def _init():
            m_e[...] = jnp.full_like(m_e, -jnp.inf)
            l_e[...] = jnp.zeros_like(l_e)
            m_b[...] = jnp.full_like(m_b, -jnp.inf)
            l_b[...] = jnp.zeros_like(l_b)

        def _matmul():
            # z is pre-cast in the wrapper to wt's dtype; f32 MXU accumulation.
            return jnp.dot(z_ref[...], wt_ref[...],
                           preferred_element_type=jnp.float32) + b_ref[...]

        def _batchnorm(eta):
            mean = jnp.mean(eta, axis=0, keepdims=True)
            var = jnp.mean((eta - mean) ** 2, axis=0, keepdims=True)
            return (eta - mean) * jax.lax.rsqrt(var + 0.001) + bnb_ref[...]

        @pl.when(phase == 0)
        def _stats():
            eta = _matmul()
            if cache_eta:
                eta_c[v] = eta                       # persistent VMEM cache
            eta_bn = _batchnorm(eta)

            me = jnp.maximum(m_e[...], jnp.max(eta, axis=-1, keepdims=True))
            l_e[...] = (l_e[...] * jnp.exp(m_e[...] - me)
                        + jnp.sum(jnp.exp(eta - me), axis=-1, keepdims=True))
            m_e[...] = me

            mb = jnp.maximum(m_b[...], jnp.max(eta_bn, axis=-1, keepdims=True))
            l_b[...] = (l_b[...] * jnp.exp(m_b[...] - mb)
                        + jnp.sum(jnp.exp(eta_bn - mb), axis=-1, keepdims=True))
            m_b[...] = mb

        @pl.when(phase == 1)
        def _emit():
            # Cached path: eta is bitwise-identical to phase 0 and the weight
            # BlockSpec is pinned to block 0 (no weight DMAs this phase).
            eta = eta_c[v] if cache_eta else _matmul()
            eta_bn = _batchnorm(eta)
            af = af_ref[0]
            inv_le = pl.reciprocal(l_e[...], approx=False)
            inv_lb = pl.reciprocal(l_b[...], approx=False)
            out_ref[...] = (af * (jnp.exp(eta - m_e[...]) * inv_le)
                            + (1.0 - af) * (jnp.exp(eta_bn - m_b[...]) * inv_lb)
                            ).astype(out_ref.dtype)
            # TODO(synk): if profiling shows the single EUP unit binding, cache
            #   exp(eta - m_snapshot) tiles in phase 0 and only rescale here.

    return kernel


# ----------------------------------------------------------------------------
# Parameter prep (one-time, at init -- NOT per call)
# ----------------------------------------------------------------------------
def prepare_decoder_params(weight, bias, bn_bias, param_dtype=jnp.bfloat16,
                           pad_to=512):
    """weight: (V, T) PyTorch nn.Linear layout.

    Returns (wt, bias2, bn_bias2, valid_v):
      wt:       (T, V_pad) weight, V padded to a multiple of `pad_to`,
                cast to `param_dtype` (bf16 by default -- the kernel is
                weight-HBM-bound; f32 MXU accumulation is kept in-kernel).
      bias2 / bn_bias2: (1, V_pad) f32; padded columns get a large negative
                bias so they contribute exp() == 0 to both softmax paths.
      valid_v:  original V (slice the kernel output to this width).
    """
    weight = jnp.asarray(weight, jnp.float32)
    V, T = weight.shape
    pad_to = max(int(pad_to), 128)
    V_pad = ((V + pad_to - 1) // pad_to) * pad_to

    wt = weight.T                                              # (T, V)
    b = jnp.asarray(bias, jnp.float32).reshape(1, V)
    bnb = jnp.asarray(bn_bias, jnp.float32).reshape(1, V)
    if V_pad != V:
        pad = V_pad - V
        wt = jnp.concatenate([wt, jnp.zeros((T, pad), jnp.float32)], axis=1)
        b = jnp.concatenate([b, jnp.full((1, pad), _PAD_NEG, jnp.float32)], axis=1)
        bnb = jnp.concatenate([bnb, jnp.full((1, pad), _PAD_NEG, jnp.float32)], axis=1)
    if param_dtype is not None:
        wt = wt.astype(param_dtype)
    return wt, b, bnb, V
    # TODO(synk): optional fp8 (v7x) / int8 (v5e,v6e) weight compression with
    #   per-column scales folded into the epilogue is not implemented here.


# ----------------------------------------------------------------------------
# pallas_call wrappers
# ----------------------------------------------------------------------------
def _single_shot_call(af, z, wt, b2, bnb2, B, T, V_pad, out_dtype, footprint):
    w_bytes = jnp.dtype(wt.dtype).itemsize
    vmem_limit = int(min(max(4 * footprint, 16 << 20), 32 << 20))
    cost = pl.CostEstimate(
        flops=int(2 * B * T * V_pad + 10 * B * V_pad),
        transcendentals=int(2 * B * V_pad),
        bytes_accessed=int(T * V_pad * w_bytes
                           + B * V_pad * jnp.dtype(out_dtype).itemsize
                           + B * T * jnp.dtype(z.dtype).itemsize + 2 * V_pad * 4))
    grid_spec = pltpu.PrefetchScalarGridSpec(
        num_scalar_prefetch=0,
        grid=(1,),
        in_specs=[
            pl.BlockSpec(memory_space=pltpu.SMEM),           # af scalar
            pl.BlockSpec((B, T), lambda i: (0, 0)),          # z
            pl.BlockSpec((T, V_pad), lambda i: (0, 0)),      # W^T (full)
            pl.BlockSpec((1, V_pad), lambda i: (0, 0)),      # bias
            pl.BlockSpec((1, V_pad), lambda i: (0, 0)),      # bn beta
        ],
        out_specs=pl.BlockSpec((B, V_pad), lambda i: (0, 0)))
    return pl.pallas_call(
        _single_shot_kernel,
        out_shape=jax.ShapeDtypeStruct((B, V_pad), out_dtype),
        grid_spec=grid_spec,
        compiler_params=pltpu.CompilerParams(
            dimension_semantics=("arbitrary",),
            vmem_limit_bytes=vmem_limit),
        cost_estimate=cost,
    )(af, z, wt, b2, bnb2)


def _tiled_call(af, z, wt, b2, bnb2, B, T, V_pad, out_dtype, tile_v, cache_eta):
    w_bytes = jnp.dtype(wt.dtype).itemsize
    z_bytes = jnp.dtype(z.dtype).itemsize
    out_bytes = jnp.dtype(out_dtype).itemsize

    B8 = ((B + 7) // 8) * 8
    cache_bytes = B8 * V_pad * 4                               # (n_v, B, tile) eta cache
    if cache_eta is None:
        cache_eta = cache_bytes <= _CACHE_BUDGET
    cache_bytes = cache_bytes if cache_eta else 0

    # Per-vocab-column VMEM cost: double-buffered weight tile + output tile + biases.
    per_col = 2 * T * w_bytes + 2 * B * out_bytes + 4 * 4
    fixed = cache_bytes + B * T * z_bytes + 4 * B * 4

    if tile_v is None:
        avail = max(_VMEM_BUDGET - fixed, per_col * 128)
        cap = int(min(16384, avail // per_col, V_pad))
        cap = max(128, (cap // 128) * 128)
        t = cap
        while t >= 128 and V_pad % t != 0:
            t -= 128
        tile_v = t if t >= 128 else V_pad
    assert V_pad % tile_v == 0 and tile_v % 128 == 0
    n_v = V_pad // tile_v

    vmem_limit = int(min(max(2 * (fixed + per_col * tile_v), 16 << 20), 40 << 20))

    weight_passes = 1 if cache_eta else 2
    cost = pl.CostEstimate(
        flops=int(2 * weight_passes * B * T * V_pad + 20 * B * V_pad),
        transcendentals=int(4 * B * V_pad),
        bytes_accessed=int(weight_passes * T * V_pad * w_bytes
                           + B * V_pad * out_bytes + B * T * z_bytes + 4 * V_pad * 4))

    if cache_eta:
        # Phase 1 reads the VMEM eta cache -> pin the weight to block 0 so the
        # dominant HBM stream is only read once (phase 0).
        wt_map = lambda p, v: (0, v * (1 - p))
        scratch = [pltpu.VMEM((n_v, B, tile_v), jnp.float32)]
    else:
        wt_map = lambda p, v: (0, v)
        scratch = []
    scratch += [pltpu.VMEM((B, 1), jnp.float32)] * 4           # m_e, l_e, m_b, l_b

    grid_spec = pltpu.PrefetchScalarGridSpec(
        num_scalar_prefetch=0,
        grid=(2, n_v),                                         # (phase, vocab tile)
        in_specs=[
            pl.BlockSpec(memory_space=pltpu.SMEM),             # af scalar
            pl.BlockSpec((B, T), lambda p, v: (0, 0)),         # z: resident
            pl.BlockSpec((T, tile_v), wt_map),                 # W^T streamed over V
            pl.BlockSpec((1, tile_v), lambda p, v: (0, v)),    # bias
            pl.BlockSpec((1, tile_v), lambda p, v: (0, v)),    # bn beta
        ],
        # Park the output on block 0 during the stats phase (no writebacks of
        # untouched buffers); write the real blocks during phase 1.
        out_specs=pl.BlockSpec((B, tile_v), lambda p, v: (0, v * p)),
        scratch_shapes=scratch)

    return pl.pallas_call(
        _make_tiled_kernel(cache_eta),
        out_shape=jax.ShapeDtypeStruct((B, V_pad), out_dtype),
        grid_spec=grid_spec,
        compiler_params=pltpu.CompilerParams(
            # Both grid axes carry cross-step state (phase ordering, eta cache,
            # online-softmax accumulators) -> neither can be megacore-parallel.
            # TODO(synk): v7x dual-TensorCore split of the V axis (per-core
            #   partial (m, l) stats + cross-core combine via VMEM_SHARED /
            #   core_barrier) is not implemented here.
            dimension_semantics=("arbitrary", "arbitrary"),
            vmem_limit_bytes=vmem_limit),
        cost_estimate=cost,
    )(af, z, wt, b2, bnb2)


def decoder_forward(z, wt, bias2, bn_bias2, bn_annealing_factor=0.0, *,
                    valid_v=None, tile_v=None, out_dtype=jnp.float32,
                    force_tiled=False, cache_eta=None):
    """z: (B, T); wt/bias2/bn_bias2 from prepare_decoder_params.
    Returns x_recon of shape (B, valid_v) (or (B, V_pad) if valid_v is None)."""
    B, T = z.shape
    Tw, V_pad = wt.shape
    assert Tw == T and bias2.shape == (1, V_pad) and bn_bias2.shape == (1, V_pad)
    assert V_pad % 128 == 0, "use prepare_decoder_params (pads V to 128-multiple)"

    if z.dtype != wt.dtype:          # cast once here, not per grid step
        z = z.astype(wt.dtype)

    af = jnp.full((1,), bn_annealing_factor, dtype=jnp.float32)
    w_bytes = jnp.dtype(wt.dtype).itemsize
    z_bytes = jnp.dtype(z.dtype).itemsize

    single_shot_bytes = (T * V_pad * w_bytes + B * T * z_bytes
                         + 2 * V_pad * 4 + 6 * B * V_pad * 4)
    if not force_tiled and single_shot_bytes <= _SINGLE_SHOT_BYTES:
        out = _single_shot_call(af, z, wt, bias2, bn_bias2, B, T, V_pad,
                                out_dtype, single_shot_bytes)
    else:
        out = _tiled_call(af, z, wt, bias2, bn_bias2, B, T, V_pad,
                          out_dtype, tile_v, cache_eta)

    if valid_v is not None and valid_v < V_pad:
        out = out[:, :valid_v]
    return out


# ----------------------------------------------------------------------------
# Pure-JAX reference
# ----------------------------------------------------------------------------
def reference_forward(z, weight, bias, bn_bias, bn_annealing_factor=0.0):
    eta = z @ weight.T + bias
    mean = jnp.mean(eta, axis=0, keepdims=True)
    var = jnp.mean((eta - mean) ** 2, axis=0, keepdims=True)
    eta_bn = (eta - mean) / jnp.sqrt(var + 0.001) + bn_bias
    return (bn_annealing_factor * jax.nn.softmax(eta, axis=-1)
            + (1.0 - bn_annealing_factor) * jax.nn.softmax(eta_bn, axis=-1))


if __name__ == "__main__":
    # Small shapes consistent with the module: batch=8, num_topics=16, vocab=1024.
    B, T, V = 8, 16, 1024
    key = jax.random.PRNGKey(0)
    kz, kw, kb = jax.random.split(key, 3)

    z = jax.random.normal(kz, (B, T), dtype=jnp.float32)
    weight = jax.random.normal(kw, (V, T), dtype=jnp.float32) * 0.1   # PyTorch (V, T) layout
    bias = jax.random.normal(kb, (V,), dtype=jnp.float32) * 0.01
    bn_bias = jnp.zeros((V,), dtype=jnp.float32)                      # BatchNorm1d beta init
    af = 0.25
    ref = reference_forward(z, weight, bias, bn_bias, af)

    # 1) Single-shot fast path (small problem), f32 weights.
    wt, b2, bnb2, vv = prepare_decoder_params(weight, bias, bn_bias, param_dtype=None)
    out = jax.block_until_ready(decoder_forward(z, wt, b2, bnb2, af, valid_v=vv))
    assert out.shape == (B, V)
    assert jnp.allclose(out, ref, rtol=2e-2, atol=1e-6), "single-shot f32 mismatch"
    assert jnp.allclose(jnp.sum(out, axis=-1), 1.0, atol=1e-3)

    # 2) Tiled two-phase path with VMEM eta cache (single weight pass), f32.
    out_t = jax.block_until_ready(
        decoder_forward(z, wt, b2, bnb2, af, valid_v=vv, tile_v=256, force_tiled=True))
    assert jnp.allclose(out_t, ref, rtol=2e-2, atol=1e-6), "tiled (cached) f32 mismatch"
    assert jnp.allclose(jnp.sum(out_t, axis=-1), 1.0, atol=1e-3)

    # 3) Tiled fallback without eta cache (weight streamed in both phases).
    out_nc = jax.block_until_ready(
        decoder_forward(z, wt, b2, bnb2, af, valid_v=vv, tile_v=256,
                        force_tiled=True, cache_eta=False))
    assert jnp.allclose(out_nc, ref, rtol=2e-2, atol=1e-6), "tiled (no-cache) f32 mismatch"

    # 4) bf16 default weights + non-128-multiple vocab (exercises padding path).
    V2 = 1000
    weight2, bias_2, bnb_2 = weight[:V2], bias[:V2], bn_bias[:V2]
    ref2 = reference_forward(z, weight2, bias_2, bnb_2, af)
    wt2, b22, bnb22, vv2 = prepare_decoder_params(weight2, bias_2, bnb_2)  # bf16 default
    out2 = jax.block_until_ready(
        decoder_forward(z, wt2, b22, bnb22, af, valid_v=vv2, tile_v=256, force_tiled=True))
    assert out2.shape == (B, V2)
    assert jnp.allclose(out2, ref2, rtol=1e-1, atol=1e-4), "bf16 padded-V mismatch"
    assert jnp.allclose(jnp.sum(out2, axis=-1), 1.0, atol=1e-2)

    print("KERNEL_OK")
</pallas_src>

<mosaic_0001>
module attributes {stable_mosaic.version = 11 : i64} {
  func.func @_single_shot_kernel(%arg0: i32, %arg1: memref<1xf32, #tpu.memory_space<smem>>, %arg2: memref<8x16xf32, #tpu.memory_space<vmem>>, %arg3: memref<16x1024xf32, #tpu.memory_space<vmem>>, %arg4: memref<1x1024xf32, #tpu.memory_space<vmem>>, %arg5: memref<1x1024xf32, #tpu.memory_space<vmem>>, %arg6: memref<8x1024xf32, #tpu.memory_space<vmem>>) attributes {dimension_semantics = [#tpu.dimension_semantics<arbitrary>], iteration_bounds = array<i64: 1>, scalar_prefetch = 0 : i64, scratch_operands = 0 : i64, tpu.core_type = #tpu.core_type<tc>, window_params = [{transform_indices = @transform_0, window_bounds = array<i64: 1>}, {pipeline_mode = #tpu.pipeline_mode<synchronous>, transform_indices = @transform_1, window_bounds = array<i64: 8, 16>}, {pipeline_mode = #tpu.pipeline_mode<synchronous>, transform_indices = @transform_2, window_bounds = array<i64: 16, 1024>}, {pipeline_mode = #tpu.pipeline_mode<synchronous>, transform_indices = @transform_3, window_bounds = array<i64: 1, 1024>}, {pipeline_mode = #tpu.pipeline_mode<synchronous>, transform_indices = @transform_4, window_bounds = array<i64: 1, 1024>}, {pipeline_mode = #tpu.pipeline_mode<synchronous>, transform_indices = @transform_5, window_bounds = array<i64: 8, 1024>}]} {
    %c0 = arith.constant 0 : index
    %c0_0 = arith.constant 0 : index
    %0 = vector.load %arg2[%c0, %c0_0] : memref<8x16xf32, #tpu.memory_space<vmem>>, vector<8x16xf32>
    %c0_1 = arith.constant 0 : index
    %c0_2 = arith.constant 0 : index
    %1 = vector.load %arg3[%c0_1, %c0_2] : memref<16x1024xf32, #tpu.memory_space<vmem>>, vector<16x1024xf32>
    %cst = arith.constant dense<0.000000e+00> : vector<8x1024xf32>
    %2 = tpu.matmul %0, %1, %cst {dimension_numbers = #tpu.dot_dimension_numbers<[1], [0], [0], [1], [0, 0, 1, 1], [], []>} : vector<8x16xf32>, vector<16x1024xf32>, vector<8x1024xf32> -> vector<8x1024xf32>
    %c0_3 = arith.constant 0 : index
    %c0_4 = arith.constant 0 : index
    %3 = vector.load %arg4[%c0_3, %c0_4] : memref<1x1024xf32, #tpu.memory_space<vmem>>, vector<1x1024xf32>
    %4 = vector.broadcast %3 : vector<1x1024xf32> to vector<8x1024xf32>
    %5 = arith.addf %2, %4 : vector<8x1024xf32>
    %cst_5 = arith.constant dense<0.000000e+00> : vector<1024xf32>
    %6 = vector.multi_reduction <add>, %5, %cst_5 [0] : vector<8x1024xf32> to vector<1024xf32>
    %7 = vector.shape_cast %6 : vector<1024xf32> to vector<1x1024xf32>
    %cst_6 = arith.constant 8.000000e+00 : f32
    %8 = vector.broadcast %cst_6 : f32 to vector<1x1024xf32>
    %9 = arith.divf %7, %8 : vector<1x1024xf32>
    %10 = vector.broadcast %9 : vector<1x1024xf32> to vector<8x1024xf32>
    %11 = arith.subf %5, %10 : vector<8x1024xf32>
    %12 = arith.mulf %11, %11 : vector<8x1024xf32>
    %cst_7 = arith.constant dense<0.000000e+00> : vector<1024xf32>
    %13 = vector.multi_reduction <add>, %12, %cst_7 [0] : vector<8x1024xf32> to vector<1024xf32>
    %14 = vector.shape_cast %13 : vector<1024xf32> to vector<1x1024xf32>
    %cst_8 = arith.constant 8.000000e+00 : f32
    %15 = vector.broadcast %cst_8 : f32 to vector<1x1024xf32>
    %16 = arith.divf %14, %15 : vector<1x1024xf32>
    %17 = vector.broadcast %9 : vector<1x1024xf32> to vector<8x1024xf32>
    %18 = arith.subf %5, %17 : vector<8x1024xf32>
    %cst_9 = arith.constant 1.000000e-03 : f32
    %19 = vector.broadcast %cst_9 : f32 to vector<1x1024xf32>
    %20 = arith.addf %16, %19 : vector<1x1024xf32>
    %21 = math.rsqrt %20 : vector<1x1024xf32>
    %22 = vector.broadcast %21 : vector<1x1024xf32> to vector<8x1024xf32>
    %23 = arith.mulf %18, %22 : vector<8x1024xf32>
    %c0_10 = arith.constant 0 : index
    %c0_11 = arith.constant 0 : index
    %24 = vector.load %arg5[%c0_10, %c0_11] : memref<1x1024xf32, #tpu.memory_space<vmem>>, vector<1x1024xf32>
    %25 = vector.broadcast %24 : vector<1x1024xf32> to vector<8x1024xf32>
    %26 = arith.addf %23, %25 : vector<8x1024xf32>
    %c0_12 = arith.constant 0 : index
    %27 = memref.load %arg1[%c0_12] : memref<1xf32, #tpu.memory_space<smem>>
    %cst_13 = arith.constant dense<0xFF800000> : vector<8xf32>
    %28 = vector.multi_reduction <maximumf>, %5, %cst_13 [1] : vector<8x1024xf32> to vector<8xf32>
    %29 = vector.shape_cast %28 : vector<8xf32> to vector<8x1xf32>
    %30 = vector.broadcast %29 : vector<8x1xf32> to vector<8x1024xf32>
    %31 = arith.subf %5, %30 : vector<8x1024xf32>
    %32 = math.exp %31 : vector<8x1024xf32>
    %cst_14 = arith.constant dense<0.000000e+00> : vector<8xf32>
    %33 = vector.multi_reduction <add>, %32, %cst_14 [1] : vector<8x1024xf32> to vector<8xf32>
    %34 = vector.shape_cast %33 : vector<8xf32> to vector<8x1xf32>
    %35 = tpu.reciprocal %34 : vector<8x1xf32> -> vector<8x1xf32>
    %36 = vector.broadcast %35 : vector<8x1xf32> to vector<8x1024xf32>
    %37 = arith.mulf %32, %36 : vector<8x1024xf32>
    %38 = vector.broadcast %27 : f32 to vector<8x1024xf32>
    %39 = arith.mulf %38, %37 : vector<8x1024xf32>
    %cst_15 = arith.constant 1.000000e+00 : f32
    %40 = arith.subf %cst_15, %27 : f32
    %cst_16 = arith.constant dense<0xFF800000> : vector<8xf32>
    %41 = vector.multi_reduction <maximumf>, %26, %cst_16 [1] : vector<8x1024xf32> to vector<8xf32>
    %42 = vector.shape_cast %41 : vector<8xf32> to vector<8x1xf32>
    %43 = vector.broadcast %42 : vector<8x1xf32> to vector<8x1024xf32>
    %44 = arith.subf %26, %43 : vector<8x1024xf32>
    %45 = math.exp %44 : vector<8x1024xf32>
    %cst_17 = arith.constant dense<0.000000e+00> : vector<8xf32>
    %46 = vector.multi_reduction <add>, %45, %cst_17 [1] : vector<8x1024xf32> to vector<8xf32>
    %47 = vector.shape_cast %46 : vector<8xf32> to vector<8x1xf32>
    %48 = tpu.reciprocal %47 : vector<8x1xf32> -> vector<8x1xf32>
    %49 = vector.broadcast %48 : vector<8x1xf32> to vector<8x1024xf32>
    %50 = arith.mulf %45, %49 : vector<8x1024xf32>
    %51 = vector.broadcast %40 : f32 to vector<8x1024xf32>
    %52 = arith.mulf %51, %50 : vector<8x1024xf32>
    %53 = arith.addf %39, %52 : vector<8x1024xf32>
    %c0_18 = arith.constant 0 : index
    %c0_19 = arith.constant 0 : index
    %54 = vector.load %arg6[%c0_18, %c0_19] : memref<8x1024xf32, #tpu.memory_space<vmem>>, vector<8x1024xf32>
    tpu.vector_store %arg6[%c0_18, %c0_19], %53 {strides = array<i32>} : memref<8x1024xf32, #tpu.memory_space<vmem>>, vector<8x1024xf32>,
    return
  }
  func.func @transform_0(%arg0: i32) -> i32 {
    %c0_i32 = arith.constant 0 : i32
    %c0_i32_0 = arith.constant 0 : i32
    return %c0_i32 : i32
  }
  func.func @transform_1(%arg0: i32) -> (i32, i32) {
    %c0_i32 = arith.constant 0 : i32
    %c0_i32_0 = arith.constant 0 : i32
    %c0_i32_1 = arith.constant 0 : i32
    return %c0_i32, %c0_i32_0 : i32, i32
  }
  func.func @transform_2(%arg0: i32) -> (i32, i32) {
    %c0_i32 = arith.constant 0 : i32
    %c0_i32_0 = arith.constant 0 : i32
    %c0_i32_1 = arith.constant 0 : i32
    return %c0_i32, %c0_i32_0 : i32, i32
  }
  func.func @transform_3(%arg0: i32) -> (i32, i32) {
    %c0_i32 = arith.constant 0 : i32
    %c0_i32_0 = arith.constant 0 : i32
    %c0_i32_1 = arith.constant 0 : i32
    return %c0_i32, %c0_i32_0 : i32, i32
  }
  func.func @transform_4(%arg0: i32) -> (i32, i32) {
    %c0_i32 = arith.constant 0 : i32
    %c0_i32_0 = arith.constant 0 : i32
    %c0_i32_1 = arith.constant 0 : i32
    return %c0_i32, %c0_i32_0 : i32, i32
  }
  func.func @transform_5(%arg0: i32) -> (i32, i32) {
    %c0_i32 = arith.constant 0 : i32
    %c0_i32_0 = arith.constant 0 : i32
    %c0_i32_1 = arith.constant 0 : i32
    return %c0_i32, %c0_i32_0 : i32, i32
  }
}

</mosaic_0001>

<bundles_post_ra>
// kernel: tpu_custom_call.1
= control target key start
LH: loop header
LB: loop body
LE: loop exit
PB: predicated region body
PF: predicated region fallthrough
CT: control target
= control target key end

     0   :  { %11 = vsyncpa [#allocation4], 0  ;;  %s1306_s0 = inlined_call_operand.<no memory space> [shape: f32[1], index: 0, kind: input, shape index: {}]   ;;  %s1307_s1 = inlined_call_operand.hbm [shape: f32[8,16], index: 1, kind: input, shape index: {}]   ;;  %s1308_s2 = inlined_call_operand.hbm [shape: f32[16,1024], index: 2, kind: input, shape index: {}]   ;;  %s1309_s3 = inlined_call_operand.hbm [shape: f32[1,1024], index: 3, kind: input, shape index: {}]   ;;  %s1310_s4 = inlined_call_operand.hbm [shape: f32[1,1024], index: 4, kind: input, shape index: {}]   ;;  %s1311_s5 = inlined_call_operand.hbm [shape: f32[8,1024], index: 5, kind: output, shape index: {}]  }
   0x1   :  { %12 = vsyncpa [#allocation7], 0 }
   0x2   :  { %13 = vsyncpa [#allocation10], 0  ;;  %s32_s20 = sshll.u32 %s1308_s2, 4  ;;  %s33_s20 = int_to_ptr.hbm [resolvable:$true] %s32_s20 }
   0x3   :  { %14 = vsyncpa [#allocation5], 0  ;;  %s916_s21 = smov [#allocation6]   ;;  %s22_s25 = sshll.u32 %s1307_s1, 4  ;;  %s23_s25 = int_to_ptr.hbm [resolvable:$true] %s22_s25 }
   0x4   :  { %s34_s22 = sshll.u32 %s916_s21, 4  ;;  %s917_s26 = smov 1024   ;;  %s35_s22 = int_to_ptr.vmem [resolvable:$true] %s34_s22 }
   0x5   :  { %s918_s27 = smov 64   ;;  %s919_s28 = smov [#allocation3]  }
   0x6   :  { %40 = dma.hbm_to_vmem [thread:$0]  %s33_s20, 2048, %s35_s22, [#allocation7], %s917_s26, %s917_s26, %s918_s27  }
   0x7   :  { %s24_s29 = sshll.u32 %s919_s28, 4  ;;  %s46_s7 = sshll.u32 %s1309_s3, 4  ;;  %s25_s29 = int_to_ptr.vmem [resolvable:$true] %s24_s29  ;;  %s47_s7 = int_to_ptr.hbm [resolvable:$true] %s46_s7 }
   0x8   :  { %27 = dma.hbm_to_vmem [thread:$0]  %s23_s25, 128, %s25_s29, [#allocation4]  }
   0x9   :  { %s57_s9 = sshll.u32 %s1310_s4, 4  ;;  %s920_s10 = smov [#allocation8]   ;;  %s58_s9 = int_to_ptr.hbm [resolvable:$true] %s57_s9 }
   0xa   :  { %s48_s11 = sshll.u32 %s920_s10, 4  ;;  %s921_s1 = smov [#allocation9]   ;;  %s49_s11 = int_to_ptr.vmem [resolvable:$true] %s48_s11 }
   0xb   :  { %51 = dma.hbm_to_vmem [thread:$0]  %s47_s7, 128, %s49_s11, [#allocation7]  }
   0xc   :  { %s59_s12 = sshll.u32 %s921_s1, 4  ;;  %s60_s12 = int_to_ptr.vmem [resolvable:$true] %s59_s12 }
   0xd   :  { %62 = dma.hbm_to_vmem [thread:$0]  %s58_s9, 128, %s60_s12, [#allocation10]  }
   0xe   :  { %908 = dma.done.wait [#allocation4], 128  }
   0xf   :  { %909 = vsyncadd [#allocation4], 4294967168 }
  0x10   :  { %910 = dma.done.wait [#allocation7], 2176  }
  0x11   :  { %911 = vsyncadd [#allocation7], 4294965120 }
  0x12   :  { %912 = dma.done.wait [#allocation10], 128  }
  0x13   :  { %913 = vsyncadd [#allocation10], 4294967168  ;;  %v88_v0 = vld [vmem:[#allocation6 + $0x40] sm:$0xff]  ;;  %v89_v1 = vld [vmem:[#allocation6 + $0x48] sm:$0xff]  ;;  %vm114_vm0 = vcmask 130048   ;;  %v922_v17 = vmov 8.0  }
  0x14   :  { %v90_v2 = vld [vmem:[#allocation6 + $0x50] sm:$0xff]  ;;  %132 = vmatpush.msra.mxu0 %v88_v0  ;;  %152 = vmatpush.msra.mxu1 %v89_v1  ;;  %v91_v3 = vld [vmem:[#allocation6 + $0x58] sm:$0xff]  ;;  %v80_v4 = vld [vmem:[#allocation6] sm:$0xff]  ;;  %734 = vrcp.f32 %v922_v17  ;;  %s609_s13 = ssub.f32 1.0, %s1306_s0  ;;  %s706_s19 = sshll.u32 %s1311_s5, 4  ;;  %s707_s19 = int_to_ptr.hbm [resolvable:$true] %s706_s19 }
  0x15   :  { %v81_v5 = vld [vmem:[#allocation6 + $0x8] sm:$0xff]  ;;  %172 = vmatpush.msra.mxu2 %v90_v2  ;;  %192 = vmatpush.msra.mxu3 %v91_v3  ;;  %v82_v6 = vld [vmem:[#allocation6 + $0x10] sm:$0xff]  ;;  %v83_v7 = vld [vmem:[#allocation6 + $0x18] sm:$0xff] }
  0x16   :  { %v79_v8 = vld [vmem:[#allocation3] sm:$0xff]  ;;  %133 = vmatpush.msra.mxu0 %v80_v4  ;;  %153 = vmatpush.msra.mxu1 %v81_v5  ;;  %v94_v9 = vld [vmem:[#allocation6 + $0x70] sm:$0xff]  ;;  %v92_v11 = vld [vmem:[#allocation6 + $0x60] sm:$0xff] }
  0x17   :  { %173 = vmatpush.msra.mxu2 %v82_v6  ;;  %193 = vmatpush.msra.mxu3 %v83_v7  ;;  %v95_v10 = vld [vmem:[#allocation6 + $0x78] sm:$0xff]  ;;  %v93_v12 = vld [vmem:[#allocation6 + $0x68] sm:$0xff]  ;;  %v86_v13 = vld [vmem:[#allocation6 + $0x30] sm:$0xff] }
  0x18   :  { %718 = vmatmul.msk.f32.vlgmr.msra.gmra.mxu0 %vm114_vm0, %v79_v8  ;;  %719 = vmatmul.msk.f32.vlgmr.msra.gmra.mxu1 %vm114_vm0, %v79_v8  ;;  %v87_v14 = vld [vmem:[#allocation6 + $0x38] sm:$0xff]  ;;  %v84_v15 = vld [vmem:[#allocation6 + $0x20] sm:$0xff]  ;;  %v85_v16 = vld [vmem:[#allocation6 + $0x28] sm:$0xff] }
  0x19   :  { %720 = vmatmul.msk.f32.vlgmr.msra.gmra.mxu2 %vm114_vm0, %v79_v8  ;;  %721 = vmatmul.msk.f32.vlgmr.msra.gmra.mxu3 %vm114_vm0, %v79_v8  ;;  %v96_v19 = vld [vmem:[#allocation8] sm:$0xff] }
  0x1a   :  { %252 = vmatpush.msrb.mxu2 %v94_v9  ;;  %272 = vmatpush.msrb.mxu3 %v95_v10  ;;  %v735_v18 = vpop.eup %734  ;;  %v98_v21 = vperm.slane %v96_v19, 0  ;;  %v99_v22 = vperm.slane %v96_v19, 1  ;;  %v100_v31 = vperm.slane %v96_v19, 2  ;;  %v101_v32 = vperm.slane %v96_v19, 3 }
  0x1b   :  { %212 = vmatpush.msrb.mxu0 %v92_v11  ;;  %232 = vmatpush.msrb.mxu1 %v93_v12  ;;  %v327_v20 = vmul.f32 8.0, %v735_v18  ;;  %v102_v35 = vperm.slane %v96_v19, 4  ;;  %v103_v36 = vperm.slane %v96_v19, 5  ;;  %vm331_vm1 = vweird.f32 %v735_v18 }
  0x1c   :  { %253 = vmatpush.msrb.mxu2 %v86_v13  ;;  %273 = vmatpush.msrb.mxu3 %v87_v14  ;;  %v104_v46 = vperm.slane %v96_v19, 6  ;;  %v105_v53 = vperm.slane %v96_v19, 7 }
  0x1d   :  { %213 = vmatpush.msrb.mxu0 %v84_v15  ;;  %233 = vmatpush.msrb.mxu1 %v85_v16  ;;  %v328_v23 = vsub.f32 1.0, %v327_v20 }
  0x1f   :  { %v329_v28 = vmul.f32 %v735_v18, %v328_v23 }
  0x20   :  { %722 = vmatmul.msk.f32.vlgmr.msrb.gmra.mxu0 %vm114_vm0, %v79_v8  ;;  %723 = vmatmul.msk.f32.vlgmr.msrb.gmra.mxu1 %vm114_vm0, %v79_v8 }
  0x21   :  { %724 = vmatmul.msk.f32.vlgmr.msrb.gmra.mxu2 %vm114_vm0, %v79_v8  ;;  %725 = vmatmul.msk.f32.vlgmr.msrb.gmra.mxu3 %vm114_vm0, %v79_v8  ;;  %v330_v37 = vadd.f32 %v735_v18, %v329_v28 }
  0x23   :  { %v992_v54 = vsel %vm331_vm1, %v735_v18, %v330_v37 }
  0x95   :  { %v135_v24 = vpop.f32.mrf.mxu0  ;;  %v155_v25 = vpop.f32.mrf.mxu1 }
  0x96   :  { %v974_v26 = vadd.f32 %v135_v24, %v98_v21  ;;  %v976_v27 = vadd.f32 %v155_v25, %v99_v22 }
  0x98   :  { %v278_v29 = vrot.slane %v974_v26, 4  ;;  %v284_v30 = vrot.slane %v976_v27, 4 }
  0x9a   :  { %v279_v33 = vadd.f32 %v278_v29, %v974_v26  ;;  %v285_v34 = vadd.f32 %v284_v30, %v976_v27 }
  0x9c   :  { %v280_v38 = vrot.slane %v279_v33, 2  ;;  %v286_v39 = vrot.slane %v285_v34, 2  ;;  %v175_v40 = vpop.f32.mrf.mxu2  ;;  %v195_v41 = vpop.f32.mrf.mxu3 }
  0x9d   :  { %v982_v42 = vadd.f32 %v175_v40, %v100_v31  ;;  %v984_v43 = vadd.f32 %v195_v41, %v101_v32  ;;  %v215_v44 = vpop.f32.mrf.mxu0  ;;  %v235_v45 = vpop.f32.mrf.mxu1 }
  0x9e   :  { %v281_v47 = vadd.f32 %v280_v38, %v279_v33  ;;  %v287_v48 = vadd.f32 %v286_v39, %v285_v34  ;;  %v986_v49 = vadd.f32 %v215_v44, %v102_v35  ;;  %v988_v50 = vadd.f32 %v235_v45, %v103_v36 }
  0x9f   :  { %v290_v51 = vrot.slane %v982_v42, 4  ;;  %v296_v52 = vrot.slane %v984_v43, 4 }
  0xa0   :  { %v282_v55 = vrot.slane %v281_v47, 1  ;;  %v288_v56 = vrot.slane %v287_v48, 1  ;;  %v302_v57 = vrot.slane %v986_v49, 4  ;;  %v308_v58 = vrot.slane %v988_v50, 4 }
  0xa1   :  { %v291_v59 = vadd.f32 %v290_v51, %v982_v42  ;;  %v297_v60 = vadd.f32 %v296_v52, %v984_v43  ;;  %v536_v61 = vmax.f32 %v974_v26, %v986_v49  ;;  %v537_v62 = vmax.f32 %v976_v27, %v988_v50 }
  0xa2   :  { %v303_v63 = vadd.f32 %v302_v57, %v986_v49  ;;  %v309_v0 = vadd.f32 %v308_v58, %v988_v50  ;;  %v283_v1 = vadd.f32 %v282_v55, %v281_v47  ;;  %v289_v2 = vadd.f32 %v288_v56, %v287_v48 }
  0xa3   :  { %v292_v3 = vrot.slane %v291_v59, 2  ;;  %v298_v4 = vrot.slane %v297_v60, 2  ;;  %v540_v5 = vmax.f32 %v536_v61, %v537_v62 }
  0xa4   :  { %v304_v6 = vrot.slane %v303_v63, 2  ;;  %v310_v7 = vrot.slane %v309_v0, 2  ;;  %v255_v8 = vpop.f32.mrf.mxu2  ;;  %v275_v9 = vpop.f32.mrf.mxu3  ;;  %v333_v10 = vmul.f32 %v992_v54, %v283_v1  ;;  %v334_v11 = vmul.f32 %v992_v54, %v289_v2 }
  0xa5   :  { %v293_v12 = vadd.f32 %v292_v3, %v291_v59  ;;  %v299_v13 = vadd.f32 %v298_v4, %v297_v60  ;;  %v1006_v14 = vadd.f32 %v255_v8, %v104_v46  ;;  %v1008_v15 = vadd.f32 %v275_v9, %v105_v53 }
  0xa6   :  { %v305_v16 = vadd.f32 %v304_v6, %v303_v63  ;;  %v311_v17 = vadd.f32 %v310_v7, %v309_v0  ;;  %v1011_v18 = vsub.f32 %v974_v26, %v333_v10  ;;  %v1014_v19 = vsub.f32 %v976_v27, %v334_v11 }
  0xa7   :  { %v294_v20 = vrot.slane %v293_v12, 1  ;;  %v300_v21 = vrot.slane %v299_v13, 1  ;;  %v314_v22 = vrot.slane %v1006_v14, 4  ;;  %v320_v23 = vrot.slane %v1008_v15, 4 }
  0xa8   :  { %v306_v24 = vrot.slane %v305_v16, 1  ;;  %v312_v25 = vrot.slane %v311_v17, 1  ;;  %v538_v28 = vmax.f32 %v982_v42, %v1006_v14  ;;  %v539_v29 = vmax.f32 %v984_v43, %v1008_v15 }
  0xa9   :  { %v315_v30 = vadd.f32 %v314_v22, %v1006_v14  ;;  %v321_v31 = vadd.f32 %v320_v23, %v1008_v15  ;;  %v295_v32 = vadd.f32 %v294_v20, %v293_v12  ;;  %v301_v33 = vadd.f32 %v300_v21, %v299_v13 }
  0xaa   :  { %v541_v34 = vmax.f32 %v538_v28, %v539_v29  ;;  %v307_v35 = vadd.f32 %v306_v24, %v305_v16  ;;  %v313_v36 = vadd.f32 %v312_v25, %v311_v17  ;;  %v349_v37 = vmul.f32 %v1011_v18, %v1011_v18 }
  0xab   :  { %v316_v38 = vrot.slane %v315_v30, 2  ;;  %v322_v39 = vrot.slane %v321_v31, 2  ;;  %v335_v40 = vmul.f32 %v992_v54, %v295_v32  ;;  %v336_v41 = vmul.f32 %v992_v54, %v301_v33 }
  0xac   :  { %v542_v44 = vmax.f32 %v540_v5, %v541_v34  ;;  %v337_v45 = vmul.f32 %v992_v54, %v307_v35  ;;  %v338_v46 = vmul.f32 %v992_v54, %v313_v36  ;;  %v350_v47 = vmul.f32 %v1014_v19, %v1014_v19 }
  0xad   :  { %v317_v48 = vadd.f32 %v316_v38, %v315_v30  ;;  %v323_v51 = vadd.f32 %v322_v39, %v321_v31  ;;  %v1033_v52 = vsub.f32 %v982_v42, %v335_v40  ;;  %v1036_v53 = vsub.f32 %v984_v43, %v336_v41 }
  0xae   :  { %543 = vmax.xlane.f32.xlu0 %v542_v44  ;;  %v1039_v55 = vsub.f32 %v986_v49, %v337_v45  ;;  %v1042_v56 = vsub.f32 %v988_v50, %v338_v46  ;;  %v357_v57 = vrot.slane %v349_v37, 4  ;;  %v363_v58 = vrot.slane %v350_v47, 4 }
  0xaf   :  { %v318_v59 = vrot.slane %v317_v48, 1  ;;  %v324_v60 = vrot.slane %v323_v51, 1  ;;  %v351_v61 = vmul.f32 %v1033_v52, %v1033_v52  ;;  %v352_v62 = vmul.f32 %v1036_v53, %v1036_v53 }
  0xb0   :  { %v353_v63 = vmul.f32 %v1039_v55, %v1039_v55  ;;  %v354_v0 = vmul.f32 %v1042_v56, %v1042_v56  ;;  %v358_v1 = vadd.f32 %v357_v57, %v349_v37  ;;  %v364_v2 = vadd.f32 %v363_v58, %v350_v47 }
  0xb1   :  { %v319_v3 = vadd.f32 %v318_v59, %v317_v48  ;;  %v325_v4 = vadd.f32 %v324_v60, %v323_v51  ;;  %v369_v5 = vrot.slane %v351_v61, 4  ;;  %v375_v6 = vrot.slane %v352_v62, 4 }
  0xb2   :  { %v359_v7 = vrot.slane %v358_v1, 2  ;;  %v365_v8 = vrot.slane %v364_v2, 2  ;;  %v381_v9 = vrot.slane %v353_v63, 4  ;;  %v387_v10 = vrot.slane %v354_v0, 4 }
  0xb3   :  { %v339_v11 = vmul.f32 %v992_v54, %v319_v3  ;;  %v340_v12 = vmul.f32 %v992_v54, %v325_v4  ;;  %v370_v13 = vadd.f32 %v369_v5, %v351_v61  ;;  %v376_v16 = vadd.f32 %v375_v6, %v352_v62 }
  0xb4   :  { %v360_v17 = vadd.f32 %v359_v7, %v358_v1  ;;  %v366_v20 = vadd.f32 %v365_v8, %v364_v2  ;;  %v382_v21 = vadd.f32 %v381_v9, %v353_v63  ;;  %v388_v22 = vadd.f32 %v387_v10, %v354_v0 }
  0xb5   :  { %v1055_v23 = vsub.f32 %v1006_v14, %v339_v11  ;;  %v1058_v24 = vsub.f32 %v1008_v15, %v340_v12  ;;  %v371_v25 = vrot.slane %v370_v13, 2  ;;  %v377_v28 = vrot.slane %v376_v16, 2 }
  0xb6   :  { %v361_v29 = vrot.slane %v360_v17, 1  ;;  %v367_v30 = vrot.slane %v366_v20, 1  ;;  %v383_v31 = vrot.slane %v382_v21, 2  ;;  %v389_v32 = vrot.slane %v388_v22, 2 }
  0xb7   :  { %v355_v33 = vmul.f32 %v1055_v23, %v1055_v23  ;;  %v356_v34 = vmul.f32 %v1058_v24, %v1058_v24  ;;  %v372_v35 = vadd.f32 %v371_v25, %v370_v13  ;;  %v378_v36 = vadd.f32 %v377_v28, %v376_v16 }
  0xb8   :  { %v362_v37 = vadd.f32 %v361_v29, %v360_v17  ;;  %v368_v38 = vadd.f32 %v367_v30, %v366_v20  ;;  %v384_v39 = vadd.f32 %v383_v31, %v382_v21  ;;  %v390_v40 = vadd.f32 %v389_v32, %v388_v22 }
  0xb9   :  { %v373_v41 = vrot.slane %v372_v35, 1  ;;  %v379_v44 = vrot.slane %v378_v36, 1  ;;  %v393_v45 = vrot.slane %v355_v33, 4  ;;  %v399_v46 = vrot.slane %v356_v34, 4 }
  0xba   :  { %v385_v47 = vrot.slane %v384_v39, 1  ;;  %v391_v48 = vrot.slane %v390_v40, 1  ;;  %v405_v51 = vmul.f32 %v362_v37, %v992_v54  ;;  %v406_v57 = vmul.f32 %v368_v38, %v992_v54 }
  0xbb   :  { %v374_v58 = vadd.f32 %v373_v41, %v372_v35  ;;  %v380_v59 = vadd.f32 %v379_v44, %v378_v36  ;;  %v394_v60 = vadd.f32 %v393_v45, %v355_v33  ;;  %v400_v61 = vadd.f32 %v399_v46, %v356_v34 }
  0xbc   :  { %v386_v62 = vadd.f32 %v385_v47, %v384_v39  ;;  %v392_v63 = vadd.f32 %v391_v48, %v390_v40  ;;  %v1066_v0 = vadd.f32 0.001, %v405_v51  ;;  %v1068_v1 = vadd.f32 0.001, %v406_v57 }
  0xbd   :  { %v395_v2 = vrot.slane %v394_v60, 2  ;;  %v401_v3 = vrot.slane %v400_v61, 2  ;;  %v407_v4 = vmul.f32 %v374_v58, %v992_v54  ;;  %v408_v5 = vmul.f32 %v380_v59, %v992_v54 }
  0xbe   :  { %v409_v6 = vmul.f32 %v386_v62, %v992_v54  ;;  %v410_v7 = vmul.f32 %v392_v63, %v992_v54  ;;  %736 = vrsqrt.f32 %v1066_v0  ;;  %vm427_vm2 = vweird.f32 %v1066_v0 }
  0xbf   :  { %v396_v8 = vadd.f32 %v395_v2, %v394_v60  ;;  %v402_v9 = vadd.f32 %v401_v3, %v400_v61  ;;  %v1075_v10 = vadd.f32 0.001, %v407_v4  ;;  %v1077_v11 = vadd.f32 0.001, %v408_v5 }
  0xc0   :  { %v1079_v12 = vadd.f32 0.001, %v409_v6  ;;  %v1081_v13 = vadd.f32 0.001, %v410_v7  ;;  %738 = vrsqrt.f32 %v1068_v1  ;;  %vm437_vm3 = vweird.f32 %v1068_v1  ;;  %v1132_v7 = vld [vmem:[#allocation9] sm:$0xff] }
  0xc1   :  { %v397_v16 = vrot.slane %v396_v8, 1  ;;  %v403_v17 = vrot.slane %v402_v9, 1  ;;  %740 = vrsqrt.f32 %v1075_v10  ;;  %vm447_vm4 = vweird.f32 %v1075_v10 }
  0xc2   :  { %742 = vrsqrt.f32 %v1077_v11  ;;  %vm457_vm6 = vweird.f32 %v1077_v11  ;;  %vm467_vm7 = vweird.f32 %v1079_v12  ;;  %vm477_vm9 = vweird.f32 %v1081_v13 }
  0xc3   :  { %v398_v20 = vadd.f32 %v397_v16, %v396_v8  ;;  %v404_v21 = vadd.f32 %v403_v17, %v402_v9  ;;  %744 = vrsqrt.f32 %v1079_v12 }
  0xc4   :  { %v1087_v22 = vpop.eup %736  ;;  %746 = vrsqrt.f32 %v1081_v13 }
  0xc5   :  { %v411_v25 = vmul.f32 %v398_v20, %v992_v54  ;;  %v422_v28 = vmul.f32 %v1087_v22, %v1066_v0  ;;  %v412_v30 = vmul.f32 %v404_v21, %v992_v54  ;;  %vm428_vm5 = vweird.f32 %v1087_v22 }
  0xc6   :  { %v1093_v29 = vpop.eup %738  ;;  %vm1145_vm11 = vmor %vm427_vm2, %vm428_vm5 }
  0xc7   :  { %v1096_v31 = vpop.eup %740  ;;  %v1098_v32 = vadd.f32 0.001, %v411_v25  ;;  %v432_v33 = vmul.f32 %v1093_v29, %v1068_v1  ;;  %v423_v35 = vmul.f32 %v1087_v22, %v422_v28  ;;  %v1114_v40 = vadd.f32 0.001, %v412_v30 }
  0xc8   :  { %v1102_v34 = vpop.eup %742  ;;  %v442_v36 = vmul.f32 %v1096_v31, %v1075_v10  ;;  %vm438_vm12 = vweird.f32 %v1093_v29  ;;  %vm448_vm13 = vweird.f32 %v1096_v31  ;;  %v511_v28 = vperm.slane %v1132_v7, 0 }
  0xc9   :  { %v1107_v37 = vpop.eup %744  ;;  %v433_v38 = vmul.f32 %v1093_v29, %v432_v33  ;;  %v452_v54 = vmul.f32 %v1102_v34, %v1077_v11  ;;  %748 = vrsqrt.f32 %v1098_v32  ;;  %v424_v47 = vmul.f32 0.5, %v423_v35  ;;  %vm1174_vm2 = vmor %vm437_vm3, %vm438_vm12 }
  0xca   :  { %v1112_v39 = vpop.eup %746  ;;  %v443_v41 = vmul.f32 %v1096_v31, %v442_v36  ;;  %v462_v44 = vmul.f32 %v1107_v37, %v1079_v12  ;;  %750 = vrsqrt.f32 %v1114_v40  ;;  %vm468_vm8 = vweird.f32 %v1107_v37  ;;  %vm1191_vm3 = vmor %vm447_vm4, %vm448_vm13 }
  0xcb   :  { %v453_v45 = vmul.f32 %v1102_v34, %v452_v54  ;;  %v472_v46 = vmul.f32 %v1112_v39, %v1081_v13  ;;  %v434_v51 = vmul.f32 0.5, %v433_v38  ;;  %v425_v63 = vsub.f32 1.5, %v424_v47  ;;  %vm1156_vm14 = vmor %vm467_vm7, %vm468_vm8 }
  0xcc   :  { %v463_v48 = vmul.f32 %v1107_v37, %v462_v44  ;;  %v444_v57 = vmul.f32 0.5, %v443_v41  ;;  %vm478_vm10 = vweird.f32 %v1112_v39  ;;  %vm458_vm15 = vweird.f32 %v1102_v34 }
  0xcd   :  { %v473_v58 = vmul.f32 %v1112_v39, %v472_v46  ;;  %v454_v59 = vmul.f32 0.5, %v453_v45  ;;  %v435_v3 = vsub.f32 1.5, %v434_v51  ;;  %v426_v21 = vmul.f32 %v1087_v22, %v425_v63  ;;  %vm1167_vm0 = vmor %vm477_vm9, %vm478_vm10 }
  0xce   :  { %v464_v60 = vmul.f32 0.5, %v463_v48  ;;  %v445_v4 = vsub.f32 1.5, %v444_v57  ;;  %v512_v12 = vperm.slane %v1132_v7, 1  ;;  %vm487_vm5 = vweird.f32 %v1098_v32  ;;  %vm1208_vm4 = vmor %vm457_vm6, %vm458_vm15 }
  0xcf   :  { %v474_v61 = vmul.f32 0.5, %v473_v58  ;;  %v749_v62 = vpop.eup %748  ;;  %v455_v8 = vsub.f32 1.5, %v454_v59  ;;  %v436_v30 = vmul.f32 %v1093_v29, %v435_v3  ;;  %v430_v47 = vsel %vm1145_vm11, %v1087_v22, %v426_v21 }
  0xd0   :  { %v465_v2 = vsub.f32 1.5, %v464_v60  ;;  %v482_v6 = vmul.f32 %v749_v62, %v1098_v32  ;;  %v751_v20 = vpop.eup %750  ;;  %v446_v33 = vmul.f32 %v1096_v31, %v445_v4  ;;  %vm488_vm1 = vweird.f32 %v749_v62 }
  0xd1   :  { %v475_v5 = vsub.f32 1.5, %v474_v61  ;;  %v492_v36 = vmul.f32 %v751_v20, %v1114_v40  ;;  %v456_v38 = vmul.f32 %v1102_v34, %v455_v8  ;;  %v440_v48 = vsel %vm1174_vm2, %v1093_v29, %v436_v30  ;;  %vm489_vm7 = vmor %vm487_vm5, %vm488_vm1 }
  0xd2   :  { %v466_v9 = vmul.f32 %v1107_v37, %v465_v2  ;;  %v483_v17 = vmul.f32 %v749_v62, %v482_v6  ;;  %v450_v22 = vsel %vm1191_vm3, %v1096_v31, %v446_v33  ;;  %v517_v58 = vperm.slane %v1132_v7, 6 }
  0xd3   :  { %v476_v16 = vmul.f32 %v1112_v39, %v475_v5  ;;  %v493_v46 = vmul.f32 %v751_v20, %v492_v36  ;;  %v460_v57 = vsel %vm1208_vm4, %v1102_v34, %v456_v38  ;;  %vm498_vm6 = vweird.f32 %v751_v20 }
  0xd4   :  { %v484_v0 = vmul.f32 0.5, %v483_v17  ;;  %v470_v44 = vsel %vm1156_vm14, %v1107_v37, %v466_v9  ;;  %v515_v37 = vperm.slane %v1132_v7, 4  ;;  %v513_v60 = vperm.slane %v1132_v7, 2 }
  0xd5   :  { %v480_v13 = vsel %vm1167_vm0, %v1112_v39, %v476_v16  ;;  %v516_v39 = vperm.slane %v1132_v7, 5  ;;  %v494_v51 = vmul.f32 0.5, %v493_v46  ;;  %v505_v29 = vmul.f32 %v470_v44, %v1039_v55 }
  0xd6   :  { %v485_v45 = vsub.f32 1.5, %v484_v0  ;;  %v506_v31 = vmul.f32 %v480_v13, %v1042_v56  ;;  %v501_v61 = vmul.f32 %v430_v47, %v1011_v18  ;;  %v502_v63 = vmul.f32 %v440_v48, %v1014_v19 }
  0xd7   :  { %v495_v11 = vsub.f32 1.5, %v494_v51  ;;  %v503_v2 = vmul.f32 %v450_v22, %v1033_v52  ;;  %vm497_vm8 = vweird.f32 %v1114_v40  ;;  %v504_v55 = vmul.f32 %v460_v57, %v1036_v53 }
  0xd8   :  { %v486_v32 = vmul.f32 %v749_v62, %v485_v45  ;;  %v514_v56 = vperm.slane %v1132_v7, 3  ;;  %vm499_vm9 = vmor %vm497_vm8, %vm498_vm6  ;;  %v1228_v4 = vadd.f32 %v515_v37, %v505_v29  ;;  %v1230_v5 = vadd.f32 %v516_v39, %v506_v31 }
  0xd9   :  { %v496_v3 = vmul.f32 %v751_v20, %v495_v11  ;;  %v528_v6 = vadd.f32 %v512_v12, %v502_v63  ;;  %v529_v8 = vadd.f32 %v513_v60, %v503_v2 }
  0xda   :  { %v490_v59 = vsel %vm489_vm7, %v749_v62, %v486_v32  ;;  %v518_v62 = vperm.slane %v1132_v7, 7  ;;  %v530_v40 = vadd.f32 %v514_v56, %v504_v55 }
  0xdb   :  { %v507_v34 = vmul.f32 %v490_v59, %v1055_v23  ;;  %v500_v19 = vsel %vm499_vm9, %v751_v20, %v496_v3  ;;  %v527_v23 = vadd.f32 %v511_v28, %v501_v61  ;;  %v611_v16 = vmax.f32 %v528_v6, %v1230_v5 }
  0xdc   :  { %v508_v52 = vmul.f32 %v500_v19, %v1058_v24 }
  0xdd   :  { %v1232_v18 = vadd.f32 %v517_v58, %v507_v34  ;;  %v610_v53 = vmax.f32 %v527_v23, %v1228_v4 }
  0xde   :  { %v1235_v9 = vadd.f32 %v518_v62, %v508_v52 }
  0xdf   :  { %v612_v7 = vmax.f32 %v529_v8, %v1232_v18  ;;  %v614_v21 = vmax.f32 %v610_v53, %v611_v16 }
  0xe0   :  { %v613_v17 = vmax.f32 %v530_v40, %v1235_v9 }
  0xe2   :  { %v615_v25 = vmax.f32 %v612_v7, %v613_v17 }
  0xe4   :  { %v616_v30 = vmax.f32 %v614_v21, %v615_v25 }
  0xe6   :  { %617 = vmax.xlane.f32.xlu0 %v616_v30 }
 0x121   :  { %v544_v20 = vpop.xlane.xlu0 %543 }
 0x122   :  { %v545_v24 = vsub.f32 %v974_v26, %v544_v20  ;;  %v546_v28 = vsub.f32 %v976_v27, %v544_v20  ;;  %v547_v33 = vsub.f32 %v982_v42, %v544_v20  ;;  %v548_v35 = vsub.f32 %v984_v43, %v544_v20 }
 0x123   :  { %v549_v38 = vsub.f32 %v986_v49, %v544_v20  ;;  %v550_v12 = vsub.f32 %v988_v50, %v544_v20  ;;  %v551_v44 = vsub.f32 %v1006_v14, %v544_v20  ;;  %v552_v27 = vsub.f32 %v1008_v15, %v544_v20 }
 0x124   :  { %v553_v0 = vmul.f32 1.442695, %v545_v24  ;;  %v555_v36 = vmul.f32 1.442695, %v546_v28  ;;  %v557_v54 = vmul.f32 1.442695, %v547_v33 }
 0x125   :  { %v559_v41 = vmul.f32 1.442695, %v548_v35  ;;  %v561_v26 = vmul.f32 1.442695, %v549_v38  ;;  %v563_v42 = vmul.f32 1.442695, %v550_v12 }
 0x126   :  { %752 = vpow2.f32 %v553_v0  ;;  %v565_v49 = vmul.f32 1.442695, %v551_v44  ;;  %v567_v46 = vmul.f32 1.442695, %v552_v27 }
 0x127   :  { %754 = vpow2.f32 %v555_v36 }
 0x128   :  { %756 = vpow2.f32 %v557_v54 }
 0x129   :  { %758 = vpow2.f32 %v559_v41 }
 0x12a   :  { %760 = vpow2.f32 %v561_v26 }
 0x12b   :  { %762 = vpow2.f32 %v563_v42 }
 0x12c   :  { %v1249_v13 = vpop.eup %752  ;;  %764 = vpow2.f32 %v565_v49 }
 0x12d   :  { %v1251_v43 = vpop.eup %754  ;;  %766 = vpow2.f32 %v567_v46 }
 0x12e   :  { %v569_v45 = vadd.f32 %v1251_v43, %v1249_v13  ;;  %v1255_v50 = vpop.eup %756 }
 0x12f   :  { %v1258_v47 = vpop.eup %758 }
 0x130   :  { %v570_v14 = vadd.f32 %v1255_v50, %v569_v45  ;;  %v1261_v1 = vpop.eup %760 }
 0x131   :  { %v1264_v39 = vpop.eup %762 }
 0x132   :  { %v571_v15 = vadd.f32 %v1258_v47, %v570_v14  ;;  %v1267_v22 = vpop.eup %764 }
 0x133   :  { %v1270_v32 = vpop.eup %766 }
 0x134   :  { %v572_v37 = vadd.f32 %v1261_v1, %v571_v15 }
 0x136   :  { %v573_v48 = vadd.f32 %v1264_v39, %v572_v37 }
 0x138   :  { %v574_v10 = vadd.f32 %v1267_v22, %v573_v48  ;;  %v600_v48 = vstv %s1306_s0  ;;  %s923_s0 = smov [#allocation11]  }
 0x139   :  { %s704_s16 = sshll.u32 %s923_s0, 4  ;;  %s705_s16 = int_to_ptr.vmem [resolvable:$true] %s704_s16 }
 0x13a   :  { %v575_v51 = vadd.f32 %v1270_v32, %v574_v10  ;;  %v674_v10 = vstv %s609_s13 }
 0x13c   :  { %576 = vadd.xlane.f32.xlu1 %v575_v51 }
 0x159   :  { %v618_v57 = vpop.xlane.xlu0 %617 }
 0x15a   :  { %v619_v29 = vsub.f32 %v527_v23, %v618_v57  ;;  %v620_v31 = vsub.f32 %v528_v6, %v618_v57  ;;  %v621_v58 = vsub.f32 %v529_v8, %v618_v57  ;;  %v622_v59 = vsub.f32 %v530_v40, %v618_v57 }
 0x15b   :  { %v623_v63 = vsub.f32 %v1228_v4, %v618_v57  ;;  %v624_v34 = vsub.f32 %v1230_v5, %v618_v57  ;;  %v625_v3 = vsub.f32 %v1232_v18, %v618_v57  ;;  %v626_v56 = vsub.f32 %v1235_v9, %v618_v57 }
 0x15c   :  { %v627_v11 = vmul.f32 1.442695, %v619_v29  ;;  %v629_v60 = vmul.f32 1.442695, %v620_v31  ;;  %v631_v61 = vmul.f32 1.442695, %v621_v58 }
 0x15d   :  { %v633_v2 = vmul.f32 1.442695, %v622_v59  ;;  %v635_v55 = vmul.f32 1.442695, %v623_v63  ;;  %v637_v62 = vmul.f32 1.442695, %v624_v34 }
 0x15e   :  { %768 = vpow2.f32 %v627_v11  ;;  %v639_v23 = vmul.f32 1.442695, %v625_v3  ;;  %v641_v5 = vmul.f32 1.442695, %v626_v56 }
 0x15f   :  { %770 = vpow2.f32 %v629_v60 }
 0x160   :  { %772 = vpow2.f32 %v631_v61 }
 0x161   :  { %774 = vpow2.f32 %v633_v2 }
 0x162   :  { %776 = vpow2.f32 %v635_v55 }
 0x163   :  { %778 = vpow2.f32 %v637_v62 }
 0x164   :  { %v1277_v19 = vpop.eup %768  ;;  %780 = vpow2.f32 %v639_v23 }
 0x165   :  { %v1279_v52 = vpop.eup %770  ;;  %782 = vpow2.f32 %v641_v5 }
 0x166   :  { %v643_v4 = vadd.f32 %v1279_v52, %v1277_v19  ;;  %v1283_v6 = vpop.eup %772 }
 0x167   :  { %v775_v8 = vpop.eup %774 }
 0x168   :  { %v644_v18 = vadd.f32 %v1283_v6, %v643_v4  ;;  %v777_v9 = vpop.eup %776 }
 0x169   :  { %v779_v16 = vpop.eup %778 }
 0x16a   :  { %v645_v40 = vadd.f32 %v775_v8, %v644_v18  ;;  %v781_v17 = vpop.eup %780 }
 0x16b   :  { %v783_v25 = vpop.eup %782 }
 0x16c   :  { %v646_v53 = vadd.f32 %v777_v9, %v645_v40 }
 0x16e   :  { %v647_v7 = vadd.f32 %v779_v16, %v646_v53 }
 0x170   :  { %v648_v21 = vadd.f32 %v781_v17, %v647_v7 }
 0x172   :  { %v649_v30 = vadd.f32 %v783_v25, %v648_v21 }
 0x174   :  { %650 = vadd.xlane.f32.xlu1 %v649_v30 }
 0x1af   :  { %v577_v20 = vpop.xlane.xlu1 %576 }
 0x1b0   :  { %784 = vrcp.f32 %v577_v20  ;;  %v589_v38 = vand.u32 2147483648, %v577_v20  ;;  %vm583_vm11 = vweird.f32 %v577_v20  ;;  %v587_v54 = vand.u32 2147483647, %v577_v20 }
 0x1b2   :  { %v590_v44 = vor.u32 1.1754944e-38, %v589_v38  ;;  %vm588_vm13 = vcmp.eq.f32.partialorder %v587_v54, 8.507059e+37 }
 0x1b6   :  { %v785_v24 = vpop.eup %784 }
 0x1b7   :  { %v579_v28 = vmul.f32 %v785_v24, %v577_v20  ;;  %vm584_vm10 = vweird.f32 %v785_v24 }
 0x1b8   :  { %vm585_vm12 = vmor %vm583_vm11, %vm584_vm10 }
 0x1b9   :  { %v580_v33 = vsub.f32 1.0, %v579_v28 }
 0x1bb   :  { %v581_v35 = vmul.f32 %v785_v24, %v580_v33 }
 0x1bd   :  { %v582_v36 = vadd.f32 %v785_v24, %v581_v35 }
 0x1bf   :  { %v586_v41 = vsel %vm585_vm12, %v785_v24, %v582_v36 }
 0x1c0   :  { %v591_v27 = vsel %vm588_vm13, %v590_v44, %v586_v41 }
 0x1c1   :  { %v592_v14 = vmul.f32 %v1249_v13, %v591_v27  ;;  %v593_v15 = vmul.f32 %v1251_v43, %v591_v27  ;;  %v594_v37 = vmul.f32 %v1255_v50, %v591_v27  ;;  %v595_v57 = vmul.f32 %v1258_v47, %v591_v27 }
 0x1c2   :  { %v596_v29 = vmul.f32 %v1261_v1, %v591_v27  ;;  %v597_v31 = vmul.f32 %v1264_v39, %v591_v27  ;;  %v598_v13 = vmul.f32 %v1267_v22, %v591_v27  ;;  %v599_v43 = vmul.f32 %v1270_v32, %v591_v27 }
 0x1c3   :  { %v601_v59 = vmul.f32 %v600_v48, %v592_v14  ;;  %v602_v11 = vmul.f32 %v600_v48, %v593_v15  ;;  %v603_v60 = vmul.f32 %v600_v48, %v594_v37  ;;  %v604_v23 = vmul.f32 %v600_v48, %v595_v57 }
 0x1c4   :  { %v605_v4 = vmul.f32 %v600_v48, %v596_v29 }
 0x1e7   :  { %v651_v0 = vpop.xlane.xlu1 %650 }
 0x1e8   :  { %786 = vrcp.f32 %v651_v0  ;;  %v663_v49 = vand.u32 2147483648, %v651_v0  ;;  %v661_v46 = vand.u32 2147483647, %v651_v0  ;;  %vm657_vm15 = vweird.f32 %v651_v0 }
 0x1ea   :  { %v664_v58 = vor.u32 1.1754944e-38, %v663_v49  ;;  %vm662_vm1 = vcmp.eq.f32.partialorder %v661_v46, 8.507059e+37 }
 0x1ee   :  { %v787_v12 = vpop.eup %786 }
 0x1ef   :  { %v653_v26 = vmul.f32 %v787_v12, %v651_v0  ;;  %vm658_vm14 = vweird.f32 %v787_v12 }
 0x1f0   :  { %vm659_vm0 = vmor %vm657_vm15, %vm658_vm14 }
 0x1f1   :  { %v654_v42 = vsub.f32 1.0, %v653_v26 }
 0x1f3   :  { %v655_v45 = vmul.f32 %v787_v12, %v654_v42 }
 0x1f5   :  { %v656_v51 = vadd.f32 %v787_v12, %v655_v45 }
 0x1f7   :  { %v660_v50 = vsel %vm659_vm0, %v787_v12, %v656_v51 }
 0x1f8   :  { %v665_v61 = vsel %vm662_vm1, %v664_v58, %v660_v50 }
 0x1f9   :  { %v666_v63 = vmul.f32 %v1277_v19, %v665_v61  ;;  %v667_v47 = vmul.f32 %v1279_v52, %v665_v61  ;;  %v668_v1 = vmul.f32 %v1283_v6, %v665_v61  ;;  %v669_v2 = vmul.f32 %v775_v8, %v665_v61 }
 0x1fa   :  { %v670_v39 = vmul.f32 %v777_v9, %v665_v61  ;;  %v671_v34 = vmul.f32 %v779_v16, %v665_v61  ;;  %v672_v3 = vmul.f32 %v781_v17, %v665_v61  ;;  %v673_v55 = vmul.f32 %v783_v25, %v665_v61 }
 0x1fb   :  { %v675_v22 = vmul.f32 %v674_v10, %v666_v63  ;;  %v676_v56 = vmul.f32 %v674_v10, %v667_v47  ;;  %v677_v32 = vmul.f32 %v674_v10, %v668_v1  ;;  %v678_v62 = vmul.f32 %v674_v10, %v669_v2 }
 0x1fc   :  { %v679_v5 = vmul.f32 %v674_v10, %v670_v39  ;;  %v680_v18 = vmul.f32 %v674_v10, %v671_v34  ;;  %v681_v40 = vmul.f32 %v674_v10, %v672_v3  ;;  %v606_v52 = vmul.f32 %v600_v48, %v597_v31 }
 0x1fd   :  { %v683_v53 = vadd.f32 %v675_v22, %v601_v59  ;;  %v684_v19 = vadd.f32 %v676_v56, %v602_v11  ;;  %v685_v7 = vadd.f32 %v677_v32, %v603_v60  ;;  %v682_v21 = vmul.f32 %v674_v10, %v673_v55 }
 0x1fe   :  { %v686_v6 = vadd.f32 %v678_v62, %v604_v23  ;;  %v607_v8 = vmul.f32 %v600_v48, %v598_v13  ;;  %v687_v9 = vadd.f32 %v679_v5, %v605_v4  ;;  %v608_v16 = vmul.f32 %v600_v48, %v599_v43 }
 0x1ff   :  { %691 = vst [vmem:[#allocation11] sm:$0xff] %v683_v53  ;;  %v688_v17 = vadd.f32 %v680_v18, %v606_v52 }
 0x200   :  { %692 = vst [vmem:[#allocation11 + $0x8] sm:$0xff] %v684_v19  ;;  %v689_v25 = vadd.f32 %v681_v40, %v607_v8  ;;  %v690_v30 = vadd.f32 %v682_v21, %v608_v16 }
 0x201   :  { %693 = vst [vmem:[#allocation11 + $0x10] sm:$0xff] %v685_v7 }
 0x202   :  { %694 = vst [vmem:[#allocation11 + $0x18] sm:$0xff] %v686_v6 }
 0x203   :  { %695 = vst [vmem:[#allocation11 + $0x20] sm:$0xff] %v687_v9 }
 0x204   :  { %696 = vst [vmem:[#allocation11 + $0x28] sm:$0xff] %v688_v17 }
 0x205   :  { %697 = vst [vmem:[#allocation11 + $0x30] sm:$0xff] %v689_v25 }
 0x206   :  { %698 = vst [vmem:[#allocation11 + $0x38] sm:$0xff] %v690_v30 }
 0x207   :  { %709 = dma.vmem_to_hbm [thread:$0]  %s705_s16, 1024, %s707_s19, [#allocation5]  }
 0x208   :  { %914 = dma.done.wait [#allocation5], 1024  }
 0x209   :  { %915 = vsyncadd [#allocation5], 4294966272 }
 0x20a   :  { %714 = vsyncpa [#allocation4], 1 }
 0x20b   :  { %715 = vsyncpa [#allocation7], 1 }
 0x20c   :  { %716 = vsyncpa [#allocation10], 1 }
 0x20d   :  { %717 = vsyncpa [#allocation5], 1 }

</bundles_post_ra>
